<compile_context>
chip_gen: v7x
topology: tpu7x:2x2x1
jax: 0.10.0
libtpu: 0.0.40
codegen_flags: <defaults>
</compile_context>

<pallas_src>
import functools
import math

import jax
import jax.numpy as jnp
from jax.experimental import pallas as pl
from jax.experimental.pallas import tpu as pltpu


def _decoder_block_kernel(
    x_ref,      # (bt, T, C)   activations for this batch tile (f32)
    g1_ref,     # (1, C)       lnorm1 weight (bias=False)
    wqkv_ref,   # (C, 3C)      fused [q|k|v] projection, bf16 (scale folded in q)
    wo_ref,     # (C, C)       attn out-projection (fc.weight.T), bf16
    bo_ref,     # (1, C)       fc bias
    g2_ref,     # (1, C)       lnorm2 weight (bias=False)
    w1_ref,     # (C, 4C)      fc1.weight.T, bf16
    b1_ref,     # (1, 4C)
    w2_ref,     # (4C, C)      fc2.weight.T, bf16
    b2_ref,     # (1, C)
    o_ref,      # (bt, T, C)
    *,
    n_head: int,
    head_size: int,
):
    f32, bf16 = jnp.float32, jnp.bfloat16
    bt, T, C = x_ref.shape
    hs = head_size
    rows = bt * T
    eps = 1e-5

    def layernorm(v, gamma):                       # f32 VPU math (v5e-safe)
        mu = jnp.mean(v, axis=-1, keepdims=True)
        d = v - mu
        var = jnp.mean(d * d, axis=-1, keepdims=True)
        return d * jax.lax.rsqrt(var + eps) * gamma

    # ---- fold (batch, seq) into the matmul M dimension ----
    x2 = x_ref[...].astype(f32).reshape(rows, C)

    # ---- x + attn(lnorm1(x)) ----
    ln1 = layernorm(x2, g1_ref[0])

    # One lane-dense QKV matmul: (rows, C) @ (C, 3C), bf16 in / f32 acc.
    qkv = jnp.dot(ln1.astype(bf16), wqkv_ref[...],
                  preferred_element_type=f32)                # (rows, 3C)

    # q/k/v split at C-aligned lane offsets (multiples of 128 at production C).
    q = qkv[:, 0 * C:1 * C]       # 1/sqrt(hs) already folded into Wq columns
    k = qkv[:, 1 * C:2 * C]
    v = qkv[:, 2 * C:3 * C]

    def split_heads(a2):          # (rows, C) -> (n_head * bt, T, hs) bf16
        parts = [a2[:, h * hs:(h + 1) * hs] for h in range(n_head)]
        return jnp.stack(parts, axis=0).reshape(n_head * bt, T, hs).astype(bf16)

    qh, kh, vh = split_heads(q), split_heads(k), split_heads(v)

    # Additive causal bias (finite -1e30, avoids NaN from exp(-inf - m)).
    row_i = jax.lax.broadcasted_iota(jnp.int32, (T, T), 0)
    col_i = jax.lax.broadcasted_iota(jnp.int32, (T, T), 1)
    bias = jnp.where(col_i <= row_i, 0.0, -1e30).astype(f32)

    s = jnp.einsum("gtd,gsd->gts", qh, kh,
                   preferred_element_type=f32) + bias[None]  # (nh*bt, T, T)
    m = jnp.max(s, axis=-1, keepdims=True)
    p = jnp.exp(s - m)                                       # un-normalized
    l = jnp.sum(p, axis=-1, keepdims=True)                   # (nh*bt, T, 1)

    ctx = jnp.einsum("gts,gsd->gtd", p.astype(bf16), vh,
                     preferred_element_type=f32)             # (nh*bt, T, hs)
    # Deferred softmax normalization on the small (T, hs) tensor; EUP slot.
    ctx = ctx * pl.reciprocal(l, approx=True)

    # Re-assemble concat-of-heads on the lane axis and project with ONE matmul
    # (head reduction folded into the MXU f32 accumulation).
    ctx = ctx.reshape(n_head, rows, hs)
    ctx_cat = jnp.concatenate([ctx[h] for h in range(n_head)],
                              axis=-1).astype(bf16)          # (rows, C)
    attn = jnp.dot(ctx_cat, wo_ref[...],
                   preferred_element_type=f32) + bo_ref[0]   # (rows, C)

    x1 = x2 + attn

    # ---- x1 + ff(lnorm2(x1)) ----
    ln2 = layernorm(x1, g2_ref[0])
    h1 = jnp.dot(ln2.astype(bf16), w1_ref[...],
                 preferred_element_type=f32) + b1_ref[0]
    # exact erf GELU for PyTorch parity (tanh-approx would move this to EUP)
    h1 = 0.5 * h1 * (1.0 + jax.lax.erf(h1 * (1.0 / math.sqrt(2.0))))
    h2 = jnp.dot(h1.astype(bf16), w2_ref[...],
                 preferred_element_type=f32) + b2_ref[0]

    # NOTE: with C < 128 (toy config) this store is lane-masked; production
    # configs with C >= 128 get lane-dense stores from this layout for free.
    o_ref[...] = (x1 + h2).reshape(bt, T, C).astype(o_ref.dtype)


def _pick_batch_tile(B, T, target_rows=256):
    """Fold enough sequences per grid step to make the matmul M dimension
    large (~target_rows; use ~512 on v6e), but keep >= 2 parallel grid steps
    when B allows so both v7x TensorCores stay busy."""
    bt = max(1, min(B, max(1, target_rows // max(T, 1))))
    if B >= 2:
        bt = max(1, min(bt, B // 2))
    while B % bt:
        bt -= 1
    return bt


def _vmem_limit_bytes(bt, T, C, n_head):
    """Rough per-step VMEM estimate (double-buffered operands + live
    intermediates) with ~50% headroom, clamped to a safe range."""
    H, rows = 4 * C, bt * T
    weights = 2 * 2 * (3 * C * C + C * C + C * H + H * C)        # bf16, x2 bufs
    acts = 2 * 2 * 4 * bt * T * C                                # f32 x/out, x2
    scores = 2 * 4 * n_head * bt * T * T                         # s + p, f32
    inter = 4 * rows * (3 * C + H + 4 * C)                       # qkv/mlp/misc
    est = int(1.5 * (weights + acts + scores + inter))
    return int(min(96 * 2**20, max(32 * 2**20, est)))


def decoder_block(x, params, *, n_head, head_size, target_rows=256):
    B, T, C = x.shape
    H = 4 * C
    bt = _pick_batch_tile(B, T, target_rows)

    kern = functools.partial(_decoder_block_kernel,
                             n_head=n_head, head_size=head_size)

    def const(shape):
        n = len(shape)
        return pl.BlockSpec(shape, lambda i, n=n: (0,) * n)

    return pl.pallas_call(
        kern,
        out_shape=jax.ShapeDtypeStruct((B, T, C), x.dtype),
        grid=(B // bt,),
        in_specs=[
            pl.BlockSpec((bt, T, C), lambda i: (i, 0, 0)),   # x (batch tile)
            const((1, C)),                                   # lnorm1 weight
            const((C, 3 * C)),                               # fused Wqkv (bf16)
            const((C, C)),                                   # Wo (bf16)
            const((1, C)),                                   # bo
            const((1, C)),                                   # lnorm2 weight
            const((C, H)),                                   # W1 (bf16)
            const((1, H)),                                   # b1
            const((H, C)),                                   # W2 (bf16)
            const((1, C)),                                   # b2
        ],
        out_specs=pl.BlockSpec((bt, T, C), lambda i: (i, 0, 0)),
        compiler_params=pltpu.CompilerParams(
            dimension_semantics=("parallel",),
            vmem_limit_bytes=_vmem_limit_bytes(bt, T, C, n_head)),
    )(x, params["g1"], params["wqkv"], params["wo"], params["bo"],
      params["g2"], params["w1"], params["b1"], params["w2"], params["b2"])


def decoder_block_ref(x, params, *, n_head, head_size):
    """Pure-JAX reference mirroring the PyTorch forward (dropout p=0) with the
    same bf16-operand / f32-accumulation policy as the kernel."""
    f32, bf16 = jnp.float32, jnp.bfloat16
    B, T, C = x.shape
    hs = head_size
    eps = 1e-5

    def layernorm(v, g):
        mu = jnp.mean(v, axis=-1, keepdims=True)
        d = v - mu
        var = jnp.mean(d * d, axis=-1, keepdims=True)
        return d * jax.lax.rsqrt(var + eps) * g

    ln1 = layernorm(x.astype(f32), params["g1"][0])
    qkv = jnp.einsum("btc,cd->btd", ln1.astype(bf16), params["wqkv"],
                     preferred_element_type=f32)             # (B, T, 3C)
    q, k, v = qkv[..., :C], qkv[..., C:2 * C], qkv[..., 2 * C:]

    def split_heads(a):
        return a.reshape(B, T, n_head, hs).transpose(0, 2, 1, 3).astype(bf16)

    qh, kh, vh = split_heads(q), split_heads(k), split_heads(v)
    mask = jnp.tril(jnp.ones((T, T), bool))
    s = jnp.einsum("bhtd,bhsd->bhts", qh, kh, preferred_element_type=f32)
    s = jnp.where(mask, s, -1e30)
    p = jax.nn.softmax(s, axis=-1)
    ctx = jnp.einsum("bhts,bhsd->bhtd", p.astype(bf16), vh,
                     preferred_element_type=f32)
    ctx = ctx.transpose(0, 2, 1, 3).reshape(B, T, C)
    attn = jnp.einsum("btc,cd->btd", ctx.astype(bf16), params["wo"],
                      preferred_element_type=f32) + params["bo"][0]
    x1 = x.astype(f32) + attn
    ln2 = layernorm(x1, params["g2"][0])
    h1 = jnp.einsum("btc,cf->btf", ln2.astype(bf16), params["w1"],
                    preferred_element_type=f32) + params["b1"][0]
    h1 = 0.5 * h1 * (1.0 + jax.lax.erf(h1 / math.sqrt(2.0)))
    h2 = jnp.einsum("btf,fc->btc", h1.astype(bf16), params["w2"],
                    preferred_element_type=f32) + params["b2"][0]
    return x1 + h2


def make_params(key, C, n_head):
    hs = C // n_head
    H = 4 * C
    ks = jax.random.split(key, 12)
    std = 0.02

    # per-head Linear weights with PyTorch layout (out, in) = (hs, C)
    def heads(k):
        return jax.random.normal(k, (n_head, hs, C), jnp.float32) * std

    wq, wk, wv = heads(ks[1]), heads(ks[2]), heads(ks[3])

    def pack(w):  # (n_head, hs, C) -> (C, n_head*hs), columns grouped by head
        return jnp.transpose(w, (2, 0, 1)).reshape(C, n_head * hs)

    scale = 1.0 / math.sqrt(hs)
    # kernel layout: (C, 3C) with column blocks [q | k | v], each head-major;
    # the attention scale is folded into the q columns (f32, then bf16 cast).
    wqkv = jnp.concatenate([pack(wq) * scale, pack(wk), pack(wv)],
                           axis=-1).astype(jnp.bfloat16)

    fc_w = jax.random.normal(ks[4], (C, C), jnp.float32) * std   # torch (out, in)
    wo = fc_w.T.astype(jnp.bfloat16)                             # (C, C)

    return {
        "g1": jnp.ones((1, C), jnp.float32) + 0.01 * jax.random.normal(ks[0], (1, C)),
        "wqkv": wqkv,
        "wo": wo,
        "bo": jax.random.normal(ks[5], (1, C), jnp.float32) * std,
        "g2": jnp.ones((1, C), jnp.float32) + 0.01 * jax.random.normal(ks[6], (1, C)),
        "w1": (jax.random.normal(ks[7], (H, C), jnp.float32) * std).T.astype(jnp.bfloat16),
        "b1": jax.random.normal(ks[8], (1, H), jnp.float32) * std,
        "w2": (jax.random.normal(ks[9], (C, H), jnp.float32) * std).T.astype(jnp.bfloat16),
        "b2": jax.random.normal(ks[10], (1, C), jnp.float32) * std,
    }


if __name__ == "__main__":
    # config: n_embedding=32, n_head=4, block_size=8, dropout=0.0
    B, T, C, n_head = 2, 8, 32, 4
    head_size = C // n_head

    key = jax.random.PRNGKey(0)
    kx, kp = jax.random.split(key)
    x = jax.random.normal(kx, (B, T, C), jnp.float32)
    params = make_params(kp, C, n_head)

    out = jax.block_until_ready(
        decoder_block(x, params, n_head=n_head, head_size=head_size))
    ref = decoder_block_ref(x, params, n_head=n_head, head_size=head_size)

    assert out.shape == (B, T, C)
    assert jnp.allclose(out, ref, atol=2e-3, rtol=2e-3), \
        float(jnp.max(jnp.abs(out - ref)))

    print("KERNEL_OK")
</pallas_src>

<mosaic_0001>
module attributes {stable_mosaic.version = 11 : i64} {
  func.func @_decoder_block_kernel(%arg0: i32, %arg1: memref<1x8x32xf32, #tpu.memory_space<vmem>>, %arg2: memref<1x32xf32, #tpu.memory_space<vmem>>, %arg3: memref<32x96xbf16, #tpu.memory_space<vmem>>, %arg4: memref<32x32xbf16, #tpu.memory_space<vmem>>, %arg5: memref<1x32xf32, #tpu.memory_space<vmem>>, %arg6: memref<1x32xf32, #tpu.memory_space<vmem>>, %arg7: memref<32x128xbf16, #tpu.memory_space<vmem>>, %arg8: memref<1x128xf32, #tpu.memory_space<vmem>>, %arg9: memref<128x32xbf16, #tpu.memory_space<vmem>>, %arg10: memref<1x32xf32, #tpu.memory_space<vmem>>, %arg11: memref<1x8x32xf32, #tpu.memory_space<vmem>>) attributes {dimension_semantics = [#tpu.dimension_semantics<parallel>], iteration_bounds = array<i64: 2>, scalar_prefetch = 0 : i64, scratch_operands = 0 : i64, tpu.core_type = #tpu.core_type<tc>, window_params = [{transform_indices = @transform_0, window_bounds = array<i64: 1, 8, 32>}, {pipeline_mode = #tpu.pipeline_mode<synchronous>, transform_indices = @transform_1, window_bounds = array<i64: 1, 32>}, {pipeline_mode = #tpu.pipeline_mode<synchronous>, transform_indices = @transform_2, window_bounds = array<i64: 32, 96>}, {pipeline_mode = #tpu.pipeline_mode<synchronous>, transform_indices = @transform_3, window_bounds = array<i64: 32, 32>}, {pipeline_mode = #tpu.pipeline_mode<synchronous>, transform_indices = @transform_4, window_bounds = array<i64: 1, 32>}, {pipeline_mode = #tpu.pipeline_mode<synchronous>, transform_indices = @transform_5, window_bounds = array<i64: 1, 32>}, {pipeline_mode = #tpu.pipeline_mode<synchronous>, transform_indices = @transform_6, window_bounds = array<i64: 32, 128>}, {pipeline_mode = #tpu.pipeline_mode<synchronous>, transform_indices = @transform_7, window_bounds = array<i64: 1, 128>}, {pipeline_mode = #tpu.pipeline_mode<synchronous>, transform_indices = @transform_8, window_bounds = array<i64: 128, 32>}, {pipeline_mode = #tpu.pipeline_mode<synchronous>, transform_indices = @transform_9, window_bounds = array<i64: 1, 32>}, {transform_indices = @transform_10, window_bounds = array<i64: 1, 8, 32>}]} {
    %c0 = arith.constant 0 : index
    %c0_0 = arith.constant 0 : index
    %c0_1 = arith.constant 0 : index
    %0 = vector.load %arg1[%c0, %c0_0, %c0_1] : memref<1x8x32xf32, #tpu.memory_space<vmem>>, vector<1x8x32xf32>
    %1 = vector.shape_cast %0 : vector<1x8x32xf32> to vector<8x32xf32>
    %c0_2 = arith.constant 0 : index
    %c0_3 = arith.constant 0 : index
    %2 = vector.load %arg2[%c0_2, %c0_3] : memref<1x32xf32, #tpu.memory_space<vmem>>, vector<1x32xf32>
    %3 = vector.shape_cast %2 : vector<1x32xf32> to vector<32xf32>
    %cst = arith.constant dense<0.000000e+00> : vector<8xf32>
    %4 = vector.multi_reduction <add>, %1, %cst [1] : vector<8x32xf32> to vector<8xf32>
    %5 = vector.shape_cast %4 : vector<8xf32> to vector<8x1xf32>
    %cst_4 = arith.constant 3.200000e+01 : f32
    %6 = vector.broadcast %cst_4 : f32 to vector<8x1xf32>
    %7 = arith.divf %5, %6 : vector<8x1xf32>
    %8 = vector.broadcast %7 : vector<8x1xf32> to vector<8x32xf32>
    %9 = arith.subf %1, %8 : vector<8x32xf32>
    %10 = arith.mulf %9, %9 : vector<8x32xf32>
    %cst_5 = arith.constant dense<0.000000e+00> : vector<8xf32>
    %11 = vector.multi_reduction <add>, %10, %cst_5 [1] : vector<8x32xf32> to vector<8xf32>
    %12 = vector.shape_cast %11 : vector<8xf32> to vector<8x1xf32>
    %cst_6 = arith.constant 3.200000e+01 : f32
    %13 = vector.broadcast %cst_6 : f32 to vector<8x1xf32>
    %14 = arith.divf %12, %13 : vector<8x1xf32>
    %cst_7 = arith.constant 9.99999974E-6 : f32
    %15 = vector.broadcast %cst_7 : f32 to vector<8x1xf32>
    %16 = arith.addf %14, %15 : vector<8x1xf32>
    %17 = math.rsqrt %16 : vector<8x1xf32>
    %18 = vector.broadcast %17 : vector<8x1xf32> to vector<8x32xf32>
    %19 = arith.mulf %9, %18 : vector<8x32xf32>
    %20 = vector.shape_cast %3 : vector<32xf32> to vector<1x32xf32>
    %21 = vector.broadcast %20 : vector<1x32xf32> to vector<8x32xf32>
    %22 = arith.mulf %19, %21 : vector<8x32xf32>
    %23 = arith.truncf %22 : vector<8x32xf32> to vector<8x32xbf16>
    %c0_8 = arith.constant 0 : index
    %c0_9 = arith.constant 0 : index
    %24 = vector.load %arg3[%c0_8, %c0_9] : memref<32x96xbf16, #tpu.memory_space<vmem>>, vector<32x96xbf16>
    %cst_10 = arith.constant dense<0.000000e+00> : vector<8x96xf32>
    %25 = tpu.matmul %23, %24, %cst_10 {dimension_numbers = #tpu.dot_dimension_numbers<[1], [0], [0], [1], [0, 0, 1, 1], [], []>} : vector<8x32xbf16>, vector<32x96xbf16>, vector<8x96xf32> -> vector<8x96xf32>
    %26 = vector.extract_strided_slice %25 {offsets = [0, 0], sizes = [8, 32], strides = [1, 1]} : vector<8x96xf32> to vector<8x32xf32>
    %27 = vector.extract_strided_slice %25 {offsets = [0, 32], sizes = [8, 32], strides = [1, 1]} : vector<8x96xf32> to vector<8x32xf32>
    %28 = vector.extract_strided_slice %25 {offsets = [0, 64], sizes = [8, 32], strides = [1, 1]} : vector<8x96xf32> to vector<8x32xf32>
    %29 = vector.extract_strided_slice %26 {offsets = [0, 0], sizes = [8, 8], strides = [1, 1]} : vector<8x32xf32> to vector<8x8xf32>
    %30 = vector.extract_strided_slice %26 {offsets = [0, 8], sizes = [8, 8], strides = [1, 1]} : vector<8x32xf32> to vector<8x8xf32>
    %31 = vector.extract_strided_slice %26 {offsets = [0, 16], sizes = [8, 8], strides = [1, 1]} : vector<8x32xf32> to vector<8x8xf32>
    %32 = vector.extract_strided_slice %26 {offsets = [0, 24], sizes = [8, 8], strides = [1, 1]} : vector<8x32xf32> to vector<8x8xf32>
    %33 = vector.shape_cast %29 : vector<8x8xf32> to vector<1x8x8xf32>
    %34 = vector.shape_cast %30 : vector<8x8xf32> to vector<1x8x8xf32>
    %35 = vector.shape_cast %31 : vector<8x8xf32> to vector<1x8x8xf32>
    %36 = vector.shape_cast %32 : vector<8x8xf32> to vector<1x8x8xf32>
    %37 = tpu.concatenate %33, %34, %35, %36 in 0 : vector<1x8x8xf32>, vector<1x8x8xf32>, vector<1x8x8xf32>, vector<1x8x8xf32> -> vector<4x8x8xf32>
    %38 = arith.truncf %37 : vector<4x8x8xf32> to vector<4x8x8xbf16>
    %39 = vector.extract_strided_slice %27 {offsets = [0, 0], sizes = [8, 8], strides = [1, 1]} : vector<8x32xf32> to vector<8x8xf32>
    %40 = vector.extract_strided_slice %27 {offsets = [0, 8], sizes = [8, 8], strides = [1, 1]} : vector<8x32xf32> to vector<8x8xf32>
    %41 = vector.extract_strided_slice %27 {offsets = [0, 16], sizes = [8, 8], strides = [1, 1]} : vector<8x32xf32> to vector<8x8xf32>
    %42 = vector.extract_strided_slice %27 {offsets = [0, 24], sizes = [8, 8], strides = [1, 1]} : vector<8x32xf32> to vector<8x8xf32>
    %43 = vector.shape_cast %39 : vector<8x8xf32> to vector<1x8x8xf32>
    %44 = vector.shape_cast %40 : vector<8x8xf32> to vector<1x8x8xf32>
    %45 = vector.shape_cast %41 : vector<8x8xf32> to vector<1x8x8xf32>
    %46 = vector.shape_cast %42 : vector<8x8xf32> to vector<1x8x8xf32>
    %47 = tpu.concatenate %43, %44, %45, %46 in 0 : vector<1x8x8xf32>, vector<1x8x8xf32>, vector<1x8x8xf32>, vector<1x8x8xf32> -> vector<4x8x8xf32>
    %48 = arith.truncf %47 : vector<4x8x8xf32> to vector<4x8x8xbf16>
    %49 = vector.extract_strided_slice %28 {offsets = [0, 0], sizes = [8, 8], strides = [1, 1]} : vector<8x32xf32> to vector<8x8xf32>
    %50 = vector.extract_strided_slice %28 {offsets = [0, 8], sizes = [8, 8], strides = [1, 1]} : vector<8x32xf32> to vector<8x8xf32>
    %51 = vector.extract_strided_slice %28 {offsets = [0, 16], sizes = [8, 8], strides = [1, 1]} : vector<8x32xf32> to vector<8x8xf32>
    %52 = vector.extract_strided_slice %28 {offsets = [0, 24], sizes = [8, 8], strides = [1, 1]} : vector<8x32xf32> to vector<8x8xf32>
    %53 = vector.shape_cast %49 : vector<8x8xf32> to vector<1x8x8xf32>
    %54 = vector.shape_cast %50 : vector<8x8xf32> to vector<1x8x8xf32>
    %55 = vector.shape_cast %51 : vector<8x8xf32> to vector<1x8x8xf32>
    %56 = vector.shape_cast %52 : vector<8x8xf32> to vector<1x8x8xf32>
    %57 = tpu.concatenate %53, %54, %55, %56 in 0 : vector<1x8x8xf32>, vector<1x8x8xf32>, vector<1x8x8xf32>, vector<1x8x8xf32> -> vector<4x8x8xf32>
    %58 = arith.truncf %57 : vector<4x8x8xf32> to vector<4x8x8xbf16>
    %59 = tpu.iota {dimensions = array<i32: 0>} : vector<8x8xi32>
    %60 = tpu.iota {dimensions = array<i32: 1>} : vector<8x8xi32>
    %61 = arith.cmpi sle, %60, %59 : vector<8x8xi32>
    %cst_11 = arith.constant 0.000000e+00 : f32
    %cst_12 = arith.constant -1.000000e+30 : f32
    %62 = vector.broadcast %cst_11 : f32 to vector<8x8xf32>
    %63 = vector.broadcast %cst_12 : f32 to vector<8x8xf32>
    %64 = arith.select %61, %62, %63 : vector<8x8xi1>, vector<8x8xf32>
    "tpu.trace_start"() <{level = 10 : i32, message = "gtd,gsd->gts"}> : () -> ()
    %cst_13 = arith.constant dense<0.000000e+00> : vector<4x8x8xf32>
    %65 = tpu.matmul %38, %48, %cst_13 {dimension_numbers = #tpu.dot_dimension_numbers<[2], [2], [1], [1], [0, 0, 0, 1, 1, 1], [0], [0]>} : vector<4x8x8xbf16>, vector<4x8x8xbf16>, vector<4x8x8xf32> -> vector<4x8x8xf32>
    "tpu.trace_stop"() : () -> ()
    %66 = vector.shape_cast %64 : vector<8x8xf32> to vector<1x8x8xf32>
    %67 = vector.broadcast %66 : vector<1x8x8xf32> to vector<4x8x8xf32>
    %68 = arith.addf %65, %67 : vector<4x8x8xf32>
    %cst_14 = arith.constant dense<0xFF800000> : vector<4x8xf32>
    %69 = vector.multi_reduction <maximumf>, %68, %cst_14 [2] : vector<4x8x8xf32> to vector<4x8xf32>
    %70 = vector.shape_cast %69 : vector<4x8xf32> to vector<4x8x1xf32>
    %71 = vector.broadcast %70 : vector<4x8x1xf32> to vector<4x8x8xf32>
    %72 = arith.subf %68, %71 : vector<4x8x8xf32>
    %73 = math.exp %72 : vector<4x8x8xf32>
    %cst_15 = arith.constant dense<0.000000e+00> : vector<4x8xf32>
    %74 = vector.multi_reduction <add>, %73, %cst_15 [2] : vector<4x8x8xf32> to vector<4x8xf32>
    %75 = vector.shape_cast %74 : vector<4x8xf32> to vector<4x8x1xf32>
    %76 = arith.truncf %73 : vector<4x8x8xf32> to vector<4x8x8xbf16>
    "tpu.trace_start"() <{level = 10 : i32, message = "gts,gsd->gtd"}> : () -> ()
    %cst_16 = arith.constant dense<0.000000e+00> : vector<4x8x8xf32>
    %77 = tpu.matmul %76, %58, %cst_16 {dimension_numbers = #tpu.dot_dimension_numbers<[2], [1], [1], [2], [0, 0, 0, 1, 1, 2], [0], [0]>} : vector<4x8x8xbf16>, vector<4x8x8xbf16>, vector<4x8x8xf32> -> vector<4x8x8xf32>
    "tpu.trace_stop"() : () -> ()
    %78 = tpu.reciprocal %75 {approx = true} : vector<4x8x1xf32> -> vector<4x8x1xf32>
    %79 = vector.broadcast %78 : vector<4x8x1xf32> to vector<4x8x8xf32>
    %80 = arith.mulf %77, %79 : vector<4x8x8xf32>
    %81 = vector.extract_strided_slice %80 {offsets = [0, 0, 0], sizes = [1, 8, 8], strides = [1, 1, 1]} : vector<4x8x8xf32> to vector<1x8x8xf32>
    %82 = vector.shape_cast %81 : vector<1x8x8xf32> to vector<8x8xf32>
    %83 = vector.extract_strided_slice %80 {offsets = [1, 0, 0], sizes = [1, 8, 8], strides = [1, 1, 1]} : vector<4x8x8xf32> to vector<1x8x8xf32>
    %84 = vector.shape_cast %83 : vector<1x8x8xf32> to vector<8x8xf32>
    %85 = vector.extract_strided_slice %80 {offsets = [2, 0, 0], sizes = [1, 8, 8], strides = [1, 1, 1]} : vector<4x8x8xf32> to vector<1x8x8xf32>
    %86 = vector.shape_cast %85 : vector<1x8x8xf32> to vector<8x8xf32>
    %87 = vector.extract_strided_slice %80 {offsets = [3, 0, 0], sizes = [1, 8, 8], strides = [1, 1, 1]} : vector<4x8x8xf32> to vector<1x8x8xf32>
    %88 = vector.shape_cast %87 : vector<1x8x8xf32> to vector<8x8xf32>
    %89 = tpu.concatenate %82, %84, %86, %88 in 1 : vector<8x8xf32>, vector<8x8xf32>, vector<8x8xf32>, vector<8x8xf32> -> vector<8x32xf32>
    %90 = arith.truncf %89 : vector<8x32xf32> to vector<8x32xbf16>
    %c0_17 = arith.constant 0 : index
    %c0_18 = arith.constant 0 : index
    %91 = vector.load %arg4[%c0_17, %c0_18] : memref<32x32xbf16, #tpu.memory_space<vmem>>, vector<32x32xbf16>
    %cst_19 = arith.constant dense<0.000000e+00> : vector<8x32xf32>
    %92 = tpu.matmul %90, %91, %cst_19 {dimension_numbers = #tpu.dot_dimension_numbers<[1], [0], [0], [1], [0, 0, 1, 1], [], []>} : vector<8x32xbf16>, vector<32x32xbf16>, vector<8x32xf32> -> vector<8x32xf32>
    %c0_20 = arith.constant 0 : index
    %c0_21 = arith.constant 0 : index
    %93 = vector.load %arg5[%c0_20, %c0_21] : memref<1x32xf32, #tpu.memory_space<vmem>>, vector<1x32xf32>
    %94 = vector.shape_cast %93 : vector<1x32xf32> to vector<32xf32>
    %95 = vector.shape_cast %94 : vector<32xf32> to vector<1x32xf32>
    %96 = vector.broadcast %95 : vector<1x32xf32> to vector<8x32xf32>
    %97 = arith.addf %92, %96 : vector<8x32xf32>
    %98 = arith.addf %1, %97 : vector<8x32xf32>
    %c0_22 = arith.constant 0 : index
    %c0_23 = arith.constant 0 : index
    %99 = vector.load %arg6[%c0_22, %c0_23] : memref<1x32xf32, #tpu.memory_space<vmem>>, vector<1x32xf32>
    %100 = vector.shape_cast %99 : vector<1x32xf32> to vector<32xf32>
    %cst_24 = arith.constant dense<0.000000e+00> : vector<8xf32>
    %101 = vector.multi_reduction <add>, %98, %cst_24 [1] : vector<8x32xf32> to vector<8xf32>
    %102 = vector.shape_cast %101 : vector<8xf32> to vector<8x1xf32>
    %cst_25 = arith.constant 3.200000e+01 : f32
    %103 = vector.broadcast %cst_25 : f32 to vector<8x1xf32>
    %104 = arith.divf %102, %103 : vector<8x1xf32>
    %105 = vector.broadcast %104 : vector<8x1xf32> to vector<8x32xf32>
    %106 = arith.subf %98, %105 : vector<8x32xf32>
    %107 = arith.mulf %106, %106 : vector<8x32xf32>
    %cst_26 = arith.constant dense<0.000000e+00> : vector<8xf32>
    %108 = vector.multi_reduction <add>, %107, %cst_26 [1] : vector<8x32xf32> to vector<8xf32>
    %109 = vector.shape_cast %108 : vector<8xf32> to vector<8x1xf32>
    %cst_27 = arith.constant 3.200000e+01 : f32
    %110 = vector.broadcast %cst_27 : f32 to vector<8x1xf32>
    %111 = arith.divf %109, %110 : vector<8x1xf32>
    %cst_28 = arith.constant 9.99999974E-6 : f32
    %112 = vector.broadcast %cst_28 : f32 to vector<8x1xf32>
    %113 = arith.addf %111, %112 : vector<8x1xf32>
    %114 = math.rsqrt %113 : vector<8x1xf32>
    %115 = vector.broadcast %114 : vector<8x1xf32> to vector<8x32xf32>
    %116 = arith.mulf %106, %115 : vector<8x32xf32>
    %117 = vector.shape_cast %100 : vector<32xf32> to vector<1x32xf32>
    %118 = vector.broadcast %117 : vector<1x32xf32> to vector<8x32xf32>
    %119 = arith.mulf %116, %118 : vector<8x32xf32>
    %120 = arith.truncf %119 : vector<8x32xf32> to vector<8x32xbf16>
    %c0_29 = arith.constant 0 : index
    %c0_30 = arith.constant 0 : index
    %121 = vector.load %arg7[%c0_29, %c0_30] : memref<32x128xbf16, #tpu.memory_space<vmem>>, vector<32x128xbf16>
    %cst_31 = arith.constant dense<0.000000e+00> : vector<8x128xf32>
    %122 = tpu.matmul %120, %121, %cst_31 {dimension_numbers = #tpu.dot_dimension_numbers<[1], [0], [0], [1], [0, 0, 1, 1], [], []>} : vector<8x32xbf16>, vector<32x128xbf16>, vector<8x128xf32> -> vector<8x128xf32>
    %c0_32 = arith.constant 0 : index
    %c0_33 = arith.constant 0 : index
    %123 = vector.load %arg8[%c0_32, %c0_33] : memref<1x128xf32, #tpu.memory_space<vmem>>, vector<1x128xf32>
    %124 = vector.shape_cast %123 : vector<1x128xf32> to vector<128xf32>
    %125 = vector.shape_cast %124 : vector<128xf32> to vector<1x128xf32>
    %126 = vector.broadcast %125 : vector<1x128xf32> to vector<8x128xf32>
    %127 = arith.addf %122, %126 : vector<8x128xf32>
    %cst_34 = arith.constant 5.000000e-01 : f32
    %128 = vector.broadcast %cst_34 : f32 to vector<8x128xf32>
    %129 = arith.mulf %128, %127 : vector<8x128xf32>
    %cst_35 = arith.constant 0.707106769 : f32
    %130 = vector.broadcast %cst_35 : f32 to vector<8x128xf32>
    %131 = arith.mulf %127, %130 : vector<8x128xf32>
    %132 = math.erf %131 : vector<8x128xf32>
    %cst_36 = arith.constant 1.000000e+00 : f32
    %133 = vector.broadcast %cst_36 : f32 to vector<8x128xf32>
    %134 = arith.addf %133, %132 : vector<8x128xf32>
    %135 = arith.mulf %129, %134 : vector<8x128xf32>
    %136 = arith.truncf %135 : vector<8x128xf32> to vector<8x128xbf16>
    %c0_37 = arith.constant 0 : index
    %c0_38 = arith.constant 0 : index
    %137 = vector.load %arg9[%c0_37, %c0_38] : memref<128x32xbf16, #tpu.memory_space<vmem>>, vector<128x32xbf16>
    %cst_39 = arith.constant dense<0.000000e+00> : vector<8x32xf32>
    %138 = tpu.matmul %136, %137, %cst_39 {dimension_numbers = #tpu.dot_dimension_numbers<[1], [0], [0], [1], [0, 0, 1, 1], [], []>} : vector<8x128xbf16>, vector<128x32xbf16>, vector<8x32xf32> -> vector<8x32xf32>
    %c0_40 = arith.constant 0 : index
    %c0_41 = arith.constant 0 : index
    %139 = vector.load %arg10[%c0_40, %c0_41] : memref<1x32xf32, #tpu.memory_space<vmem>>, vector<1x32xf32>
    %140 = vector.shape_cast %139 : vector<1x32xf32> to vector<32xf32>
    %141 = vector.shape_cast %140 : vector<32xf32> to vector<1x32xf32>
    %142 = vector.broadcast %141 : vector<1x32xf32> to vector<8x32xf32>
    %143 = arith.addf %138, %142 : vector<8x32xf32>
    %144 = arith.addf %98, %143 : vector<8x32xf32>
    %145 = vector.shape_cast %144 : vector<8x32xf32> to vector<1x8x32xf32>
    %c0_42 = arith.constant 0 : index
    %c0_43 = arith.constant 0 : index
    %c0_44 = arith.constant 0 : index
    %146 = vector.load %arg11[%c0_42, %c0_43, %c0_44] : memref<1x8x32xf32, #tpu.memory_space<vmem>>, vector<1x8x32xf32>
    tpu.vector_store %arg11[%c0_42, %c0_43, %c0_44], %145 {strides = array<i32>} : memref<1x8x32xf32, #tpu.memory_space<vmem>>, vector<1x8x32xf32>,
    return
  }
  func.func @transform_0(%arg0: i32) -> (i32, i32, i32) {
    %c0_i32 = arith.constant 0 : i32
    %c0_i32_0 = arith.constant 0 : i32
    %c0_i32_1 = arith.constant 0 : i32
    return %arg0, %c0_i32, %c0_i32_0 : i32, i32, i32
  }
  func.func @transform_1(%arg0: i32) -> (i32, i32) {
    %c0_i32 = arith.constant 0 : i32
    %c0_i32_0 = arith.constant 0 : i32
    %c0_i32_1 = arith.constant 0 : i32
    return %c0_i32, %c0_i32_0 : i32, i32
  }
  func.func @transform_2(%arg0: i32) -> (i32, i32) {
    %c0_i32 = arith.constant 0 : i32
    %c0_i32_0 = arith.constant 0 : i32
    %c0_i32_1 = arith.constant 0 : i32
    return %c0_i32, %c0_i32_0 : i32, i32
  }
  func.func @transform_3(%arg0: i32) -> (i32, i32) {
    %c0_i32 = arith.constant 0 : i32
    %c0_i32_0 = arith.constant 0 : i32
    %c0_i32_1 = arith.constant 0 : i32
    return %c0_i32, %c0_i32_0 : i32, i32
  }
  func.func @transform_4(%arg0: i32) -> (i32, i32) {
    %c0_i32 = arith.constant 0 : i32
    %c0_i32_0 = arith.constant 0 : i32
    %c0_i32_1 = arith.constant 0 : i32
    return %c0_i32, %c0_i32_0 : i32, i32
  }
  func.func @transform_5(%arg0: i32) -> (i32, i32) {
    %c0_i32 = arith.constant 0 : i32
    %c0_i32_0 = arith.constant 0 : i32
    %c0_i32_1 = arith.constant 0 : i32
    return %c0_i32, %c0_i32_0 : i32, i32
  }
  func.func @transform_6(%arg0: i32) -> (i32, i32) {
    %c0_i32 = arith.constant 0 : i32
    %c0_i32_0 = arith.constant 0 : i32
    %c0_i32_1 = arith.constant 0 : i32
    return %c0_i32, %c0_i32_0 : i32, i32
  }
  func.func @transform_7(%arg0: i32) -> (i32, i32) {
    %c0_i32 = arith.constant 0 : i32
    %c0_i32_0 = arith.constant 0 : i32
    %c0_i32_1 = arith.constant 0 : i32
    return %c0_i32, %c0_i32_0 : i32, i32
  }
  func.func @transform_8(%arg0: i32) -> (i32, i32) {
    %c0_i32 = arith.constant 0 : i32
    %c0_i32_0 = arith.constant 0 : i32
    %c0_i32_1 = arith.constant 0 : i32
    return %c0_i32, %c0_i32_0 : i32, i32
  }
  func.func @transform_9(%arg0: i32) -> (i32, i32) {
    %c0_i32 = arith.constant 0 : i32
    %c0_i32_0 = arith.constant 0 : i32
    %c0_i32_1 = arith.constant 0 : i32
    return %c0_i32, %c0_i32_0 : i32, i32
  }
  func.func @transform_10(%arg0: i32) -> (i32, i32, i32) {
    %c0_i32 = arith.constant 0 : i32
    %c0_i32_0 = arith.constant 0 : i32
    %c0_i32_1 = arith.constant 0 : i32
    return %arg0, %c0_i32, %c0_i32_0 : i32, i32, i32
  }
}

</mosaic_0001>

<bundles_post_ra>
// kernel: tpu_custom_call.1
= control target key start
LH: loop header
LB: loop body
LE: loop exit
PB: predicated region body
PF: predicated region fallthrough
CT: control target
= control target key end

     0   :  { %15 = vsyncpa [#allocation3], 0  ;;  %s1911_s0 = inlined_call_operand.vmem [shape: f32[2,8,32], index: 0, kind: input, shape index: {}]   ;;  %s1912_s1 = inlined_call_operand.vmem [shape: f32[1,32], index: 1, kind: input, shape index: {}]   ;;  %s1913_s2 = inlined_call_operand.vmem [shape: bf16[32,96], index: 2, kind: input, shape index: {}]   ;;  %s1914_s3 = inlined_call_operand.vmem [shape: bf16[32,32], index: 3, kind: input, shape index: {}]   ;;  %s1915_s4 = inlined_call_operand.vmem [shape: f32[1,32], index: 4, kind: input, shape index: {}]   ;;  %s1916_s5 = inlined_call_operand.vmem [shape: f32[1,32], index: 5, kind: input, shape index: {}]   ;;  %s1917_s6 = inlined_call_operand.vmem [shape: bf16[32,128], index: 6, kind: input, shape index: {}]   ;;  %s1918_s7 = inlined_call_operand.vmem [shape: f32[1,128], index: 7, kind: input, shape index: {}]   ;;  %s1919_s8 = inlined_call_operand.vmem [shape: bf16[128,32], index: 8, kind: input, shape index: {}]   ;;  %s1920_s9 = inlined_call_operand.vmem [shape: f32[1,32], index: 9, kind: input, shape index: {}]   ;;  %s1921_s10 = inlined_call_operand.hbm [shape: f32[2,8,32], index: 10, kind: output, shape index: {}]  }
   0x1   :  { %17 = vsyncpa [#allocation3 + $0x1], 0  ;;  %s1646_s13 = smov 0   ;;  %s1648_s14 = smov 0  }
   0x2   :  { %s1650_s15 = smov 0   ;;  %s1652_s16 = smov 0  }
   0x3 LB: > { %s1667_s17 = sadd.s32 4294967295, %s1577_s16   ;;  %s1263_s18 = sadd.s32 4294967294, %s1577_s16   ;;  %s1577_s16 = sphi %s1652_s16, %s1927_s16   ;;  %s1573_s15 = sphi %s1650_s15, %s1926_s15   ;;  %s1569_s14 = sphi %s1648_s14, %s1925_s14   ;;  %s1565_s13 = sphi %s1646_s13, %s1924_s13  }
   0x4   : > { %s1671_s19 = sadd.s32 1, %s1577_s16   ;;  %s245_s20 = sadd.s32 1, %s1573_s15 }
   0x5   : > { %s242_s21 = ssub.s32 %s1577_s16, %s1671_s19  ;;  %p255_p0 = scmp.ne.s32.totalorder %s1573_s15, %s1569_s14 }
   0x6   : > { %p243_p1 = scmp.eq.s32.totalorder %s242_s21, 0  ;;  %p256_p2 = scmp.eq.s32.totalorder %s1667_s17, 1 }
   0x7   : > { %p261_p3 = scmp.ne.s32.totalorder %s1569_s14, %s1565_s13  ;;  %p262_p4 = scmp.eq.s32.totalorder %s1263_s18, 1 }
   0x8   : > { %s1682_s22 = scalar_select %p243_p1, %s1573_s15, %s245_s20  }
   0x9   : > { %p1684_p5 = por %p256_p2, %p255_p0  ;;  %p1688_p6 = por %p262_p4, %p261_p3 }
   0xa   : > { %p1266_p7 = scmp.ge.s32.totalorder %s1577_s16, 1  ;;  %p314_p8 = scmp.lt.s32.totalorder %s1577_s16, 3 }
   0xc   : > { %p315_p9 = pnand %p1266_p7, %p314_p8 }
   0xd   : > { %p351_p10 = scmp.lt.s32.totalorder (!%p315_p9), %s1667_s17, 1  ;;  %vm358_vm0 = vcmask (!%p315_p9), 261120   ;;  %v1479_v7 = vld [vmem:[%s1913_s2] sm:$0xff] (!%p315_p9)   ;;  %v1579_v8 = vmov (!%p315_p9), 0.0   ;;  %vm1580_vm1 = vmmov (!%p315_p9), 0   ;;  %v1480_v9 = vld [vmem:[%s1913_s2 + $0x8] sm:$0xff] (!%p315_p9)   ;;  %v454_v39 = vlaneseq (!%p315_p9) }
   0xe   : > { %318 = sbr.rel (%p315_p9) target bundleno = 2497 (0x9c1), region = 60  ;;  %1337 = vmatprep.subr.bf16.mxu0 (!%p315_p9), %v1579_v8  ;;  %1341 = vmatprep.mubr.msk.bf16.mxu0 (!%p315_p9), %vm1580_vm1, %v1579_v8  ;;  %v1269_v14 = vld [vmem:[%s1912_s1] ss:$0 sm:$0xff] (!%p315_p9)  ;;  %s1583_s27 = smov (!%p315_p9), 112   ;;  %vm463_vm2 = vcmask (!%p315_p9), 64512   ;;  %vm702_vm3 = vcmask (!%p315_p9), 1043456  }
   0xf   : > { %1338 = vmatpush3.bf16.msra.mxu0 (!%p315_p9), %v1479_v7  ;;  %1357 = vmatprep.subr.bf16.mxu1 (!%p315_p9), %v1579_v8  ;;  %s1584_s28 = smov (!%p315_p9), 96   ;;  %v455_v40 = vshrl.u32 (!%p315_p9), %v454_v39, 7  ;;  %v457_v41 = vand.u32 (!%p315_p9), 127, %v454_v39  ;;  %v1586_v42 = vmov (!%p315_p9), -1e+30   ;;  %s1587_s20 = smov (!%p315_p9), 8  }
  0x10   : > { %1339 = vmatprep.subr.bf16.mxu0 (!%p315_p9), %v1579_v8  ;;  %1359 = vmatprep.mubr.msk.bf16.mxu1 (!%p315_p9), %vm1580_vm1, %v1579_v8  ;;  %s1588_s21 = smov (!%p315_p9), 16   ;;  %vm911_vm5 = vcmask (!%p315_p9), 130048   ;;  %vm913_vm6 = vcmask (!%p315_p9), 195584   ;;  %s348_s30 = sand.u32 (!%p315_p9), 1, %s1569_s14  }
  0x11   : > { %vm458_vm4 = vcmp.le.s32.totalorder (!%p315_p9), %v457_v41, %v455_v40  ;;  %s1267_s11 = sshll.u32 (!%p315_p9), %s348_s30, 3 }
  0x12   : > { %v459_v43 = vsel (!%p315_p9), %vm458_vm4, 0.0, %v1586_v42  ;;  %v1481_v42 = vld [vmem:[%s1914_s3] sm:$0xff] (!%p315_p9)  }
  0x13   : > { %1340 = vmatpush3.bf16.msra.mxu0 (!%p315_p9), %v1480_v9 }
  0x14   : > { %1345 = vmatprep.subr.bf16.mxu0 (!%p315_p9), %v1579_v8 }
  0x15   : > { %s352_s25 = scalar_select %p351_p10, %s1667_s17, 1 }
  0x17   : > { %s1268_s26 = sshll.u32 %s352_s25, 3  ;;  %s1581_s25 = smov 104  }
  0x18   : > { %s354_s29 = scalar_lea.vmem %s1911_s0, %s1268_s26  ;;  %s1582_s26 = smov 120  }
  0x19   : > { %v1699_v0 = vld [vmem:[%s354_s29] sm:$0xff]  ;;  %s1585_s29 = smov 64  }
  0x1a   : > { %v359_v1 = vsel %vm358_vm0, %v1699_v0, 0.0 }
  0x1b   : > { %360 = vadd.xlane.f32.xlu0 %v359_v1 }
  0xa8   : > { %v361_v2 = vpop.xlane.xlu0 %360 }
  0xa9   : > { %v363_v3 = vmul.f32 0.03125, %v361_v2 }
  0xab   : > { %v364_v4 = vsub.f32 %v1699_v0, %v363_v3 }
  0xad   : > { %v365_v5 = vmul.f32 %v364_v4, %v364_v4 }
  0xaf   : > { %v366_v6 = vsel %vm358_vm0, %v365_v5, 0.0 }
  0xb0   : > { %367 = vadd.xlane.f32.xlu0 %v366_v6 }
 0x13d   : > { %v368_v10 = vpop.xlane.xlu0 %367 }
 0x13e   : > { %v369_v11 = vmul.f32 0.03125, %v368_v10 }
 0x140   : > { %v370_v12 = vadd.f32 1e-05, %v369_v11 }
 0x142   : > { %1493 = vrsqrt.f32 %v370_v12 }
 0x14c   : > { %v1494_v13 = vpop.eup %1493 }
 0x14d   : > { %v372_v15 = vmul.f32 %v1494_v13, %v364_v4 }
 0x14f   : > { %v379_v16 = vmul.f32 %v1269_v14, %v372_v15 }
 0x151   : > { %v380_v17 = vpack.c.bf16 %v379_v16, %v379_v16 }
 0x153   : > { %1342 = vmatmul.mubr.msk.bf16.vlgmr.msra.gmra.mrb[0].mxu0 %vm358_vm0, %v380_v17 }
 0x154   : > { %1347 = vmatprep.mubr.msk.bf16.mxu0 %vm1580_vm1, %v1579_v8 }
 0x226   : > { %v434_v18 = vpop.f32.mrb[0].mxu0 }
 0x227   : > { %447 = vrot.lane.b32.xlu0 %v434_v18, %s1581_s25  ;;  %441 = vrot.lane.b32.xlu1 %v434_v18, %s1582_s26  ;;  %v1343_v19 = vpop.f32.mrb[1].mxu0  ;;  %v450_v22 = vpack.c.bf16 %v434_v18, %v434_v18  ;;  %s1589_s25 = smov 24  }
 0x228   : > { %v437_v20 = vpop.f32.mrb[2].mxu0 }
 0x229   : > { %v1344_v21 = vpop.f32.mrb[3].mxu0 }
 0x22b   : > { %444 = vrot.lane.b32.xlu1 %v434_v18, %s1583_s27 }
 0x22f   : > { %461 = vrot.lane.b32.xlu1 %v450_v22, %s1584_s28 }
 0x299   : > { %v442_v23 = vpop.permute.xlu1 %441  ;;  %v448_v27 = vpop.permute.xlu0 %447 }
 0x29a   : > { %v1725_v24 = vpack.c.bf16 %v442_v23, %v442_v23  ;;  %v1731_v29 = vpack.c.bf16 %v448_v27, %v448_v27 }
 0x29c   : > { %511 = vrot.lane.b32.xlu1 %v1725_v24, %s1584_s28 }
 0x29d   : > { %v445_v25 = vpop.permute.xlu1 %444 }
 0x29e   : > { %v1728_v26 = vpack.c.bf16 %v445_v25, %v445_v25 }
 0x2a0   : > { %560 = vrot.lane.b32.xlu1 %v1728_v26, %s1584_s28 }
 0x2a1   : > { %v462_v28 = vpop.permute.xlu1 %461 }
 0x2a2   : > { %v468_v30 = vsel %vm463_vm2, %v462_v28, 0 }
 0x2a3   : > { %1346 = vmatpush3.bf16.xpose.msra.mxu0 %v468_v30 }
 0x2a4   : > { %609 = vrot.lane.b32.xlu1 %v1731_v29, %s1584_s28  ;;  %1351 = vmatprep.subr.bf16.mxu0 %v1579_v8 }
 0x2a8   : > { %697 = vrot.lane.b32.xlu1 %v450_v22, %s1585_s29 }
 0x2aa   : > { %1348 = vmatmul.mubr.msk.bf16.vlgmr.msra.gmra.mrb[4].mxu0 %vm463_vm2, %v450_v22 }
 0x2ab   : > { %1353 = vmatprep.mubr.msk.bf16.mxu0 %vm1580_vm1, %v1579_v8 }
 0x30e   : > { %v512_v31 = vpop.permute.xlu1 %511 }
 0x30f   : > { %v517_v32 = vsel %vm463_vm2, %v512_v31, 0 }
 0x310   : > { %1352 = vmatpush3.bf16.xpose.msra.mxu0 %v517_v32 }
 0x311   : > { %1363 = vmatprep.subr.bf16.mxu0 %v1579_v8 }
 0x312   : > { %v561_v33 = vpop.permute.xlu1 %560 }
 0x313   : > { %v566_v34 = vsel %vm463_vm2, %v561_v33, 0 }
 0x314   : > { %1358 = vmatpush3.bf16.xpose.msra.mxu1 %v566_v34 }
 0x315   : > { %1369 = vmatprep.subr.bf16.mxu1 %v1579_v8 }
 0x316   : > { %v610_v35 = vpop.permute.xlu1 %609 }
 0x317   : > { %v615_v36 = vsel %vm463_vm2, %v610_v35, 0  ;;  %1354 = vmatmul.mubr.msk.bf16.vlgmr.msra.gmra.mrb[8].mxu0 %vm463_vm2, %v1725_v24 }
 0x318   : > { %1364 = vmatpush3.bf16.xpose.msra.mxu0 %v615_v36  ;;  %1365 = vmatprep.mubr.msk.bf16.mxu0 %vm1580_vm1, %v1579_v8 }
 0x319   : > { %1375 = vmatprep.subr.bf16.mxu0 %v1579_v8 }
 0x31a   : > { %v698_v37 = vpop.permute.xlu1 %697 }
 0x31b   : > { %v704_v38 = vsel %vm702_vm3, %v698_v37, 0  ;;  %1360 = vmatmul.mubr.msk.bf16.vlgmr.msra.gmra.mrb[0].mxu1 %vm463_vm2, %v1728_v26 }
 0x31c   : > { %1370 = vmatpush3.bf16.msra.mxu1 %v704_v38  ;;  %1371 = vmatprep.mubr.msk.bf16.mxu1 %vm1580_vm1, %v1579_v8 }
 0x31d   : > { %1381 = vmatprep.subr.bf16.mxu1 %v1579_v8 }
 0x31f   : > { %1366 = vmatmul.mubr.msk.bf16.vlgmr.msra.gmra.mrb[12].mxu0 %vm463_vm2, %v1731_v29 }
 0x320   : > { %1377 = vmatprep.mubr.msk.bf16.mxu0 %vm1580_vm1, %v1579_v8 }
 0x37d   : > { %v504_v44 = vpop.f32.mrb[4].mxu0 }
 0x37e   : > { %v505_v45 = vadd.f32 %v504_v44, %v459_v43  ;;  %v1349_v46 = vpop.f32.mrb[5].mxu0  ;;  %v1482_v44 = vld [vmem:[%s1914_s3 + $0x8] sm:$0xff]  }
 0x37f   : > { %v507_v47 = vpop.f32.mrb[6].mxu0 }
 0x380   : > { %v1350_v48 = vpop.f32.mrb[7].mxu0  ;;  %v657_v49 = vsel %vm463_vm2, %v505_v45, -inf }
 0x381   : > { %658 = vmax.xlane.f32.xlu1 %v657_v49 }
 0x3ea   : > { %v553_v50 = vpop.f32.mrb[8].mxu0 }
 0x3eb   : > { %v554_v51 = vadd.f32 %v553_v50, %v459_v43  ;;  %v1355_v52 = vpop.f32.mrb[9].mxu0 }
 0x3ec   : > { %v556_v53 = vpop.f32.mrb[10].mxu0 }
 0x3ed   : > { %v1356_v54 = vpop.f32.mrb[11].mxu0  ;;  %v660_v55 = vsel %vm463_vm2, %v554_v51, -inf }
 0x3ee   : > { %v602_v56 = vpop.f32.mrb[0].mxu1  ;;  %661 = vmax.xlane.f32.xlu0 %v660_v55 }
 0x3ef   : > { %v603_v57 = vadd.f32 %v602_v56, %v459_v43  ;;  %v1361_v58 = vpop.f32.mrb[1].mxu1 }
 0x3f0   : > { %v605_v59 = vpop.f32.mrb[2].mxu1 }
 0x3f1   : > { %v1362_v60 = vpop.f32.mrb[3].mxu1  ;;  %v663_v61 = vsel %vm463_vm2, %v603_v57, -inf }
 0x3f2   : > { %664 = vmax.xlane.f32.xlu1 %v663_v61  ;;  %v651_v62 = vpop.f32.mrb[12].mxu0 }
 0x3f3   : > { %v652_v63 = vadd.f32 %v651_v62, %v459_v43  ;;  %v1367_v1 = vpop.f32.mrb[13].mxu0 }
 0x3f4   : > { %v654_v2 = vpop.f32.mrb[14].mxu0 }
 0x3f5   : > { %v1368_v3 = vpop.f32.mrb[15].mxu0  ;;  %v666_v4 = vsel %vm463_vm2, %v652_v63, -inf }
 0x3f6   : > { %667 = vmax.xlane.f32.xlu0 %v666_v4 }
 0x403   : > { %794 = vrot.lane.b32.xlu1 %v1728_v26, %s1585_s29 }
 0x407   : > { %842 = vrot.lane.b32.xlu1 %v1731_v29, %s1585_s29 }
 0x40c   : > { %746 = vrot.lane.b32.xlu0 %v1725_v24, %s1585_s29 }
 0x40e   : > { %v659_v5 = vpop.xlane.xlu1 %658 }
 0x40f   : > { %v669_v6 = vsub.f32 %v505_v45, %v659_v5 }
 0x411   : > { %v673_v7 = vmul.f32 1.442695, %v669_v6 }
 0x413   : > { %1495 = vpow2.f32 %v673_v7 }
 0x41d   : > { %v1496_v9 = vpop.eup %1495 }
 0x41e   : > { %v693_v10 = vpack.c.bf16 %v1496_v9, %v1496_v9  ;;  %v681_v35 = vsel %vm463_vm2, %v1496_v9, 0.0 }
 0x420   : > { %1372 = vmatmul.mubr.msk.bf16.vlgmr.msra.gmra.mrb[4].mxu1 %vm463_vm2, %v693_v10 }
 0x421   : > { %1383 = vmatprep.mubr.msk.bf16.mxu1 %vm1580_vm1, %v1579_v8 }
 0x47b   : > { %v662_v11 = vpop.xlane.xlu0 %661 }
 0x47c   : > { %v670_v12 = vsub.f32 %v554_v51, %v662_v11  ;;  %v1281_v11 = vld [vmem:[%s1915_s4] ss:$0 sm:$0xff] }
 0x47e   : > { %v675_v13 = vmul.f32 1.442695, %v670_v12 }
 0x47f   : > { %v665_v14 = vpop.xlane.xlu1 %664 }
 0x480   : > { %1497 = vpow2.f32 %v675_v13  ;;  %v671_v15 = vsub.f32 %v603_v57, %v665_v14 }
 0x482   : > { %v677_v16 = vmul.f32 1.442695, %v671_v15 }
 0x483   : > { %v795_v17 = vpop.permute.xlu1 %794  ;;  %v668_v18 = vpop.xlane.xlu0 %667 }
 0x484   : > { %1499 = vpow2.f32 %v677_v16  ;;  %v800_v19 = vsel %vm702_vm3, %v795_v17, 0  ;;  %v672_v20 = vsub.f32 %v652_v63, %v668_v18 }
 0x485   : > { %1382 = vmatpush3.bf16.msra.mxu1 %v800_v19 }
 0x486   : > { %v679_v21 = vmul.f32 1.442695, %v672_v20  ;;  %1393 = vmatprep.subr.bf16.mxu1 %v1579_v8 }
 0x487   : > { %v747_v22 = vpop.permute.xlu0 %746  ;;  %v843_v25 = vpop.permute.xlu1 %842 }
 0x488   : > { %1501 = vpow2.f32 %v679_v21  ;;  %v752_v23 = vsel %vm702_vm3, %v747_v22, 0  ;;  %v848_v28 = vsel %vm702_vm3, %v843_v25, 0  ;;  %v1485_v25 = vld [vmem:[%s1919_s8] sm:$0xff]  }
 0x489   : > { %1376 = vmatpush3.bf16.msra.mxu0 %v752_v23 }
 0x48a   : > { %v1498_v24 = vpop.eup %1497  ;;  %1387 = vmatprep.subr.bf16.mxu0 %v1579_v8 }
 0x48b   : > { %v684_v26 = vsel %vm463_vm2, %v1498_v24, 0.0  ;;  %v694_v27 = vpack.c.bf16 %v1498_v24, %v1498_v24  ;;  %v1483_v24 = vld [vmem:[%s1917_s6] sm:$0xff]  }
 0x48c   : > { %685 = vadd.xlane.f32.xlu0 %v684_v26  ;;  %v1486_v26 = vld [vmem:[%s1919_s8 + $0x8] sm:$0xff]  }
 0x48d   : > { %1378 = vmatmul.mubr.msk.bf16.vlgmr.msra.gmra.mrb[16].mxu0 %vm463_vm2, %v694_v27  ;;  %v1487_v27 = vld [vmem:[%s1919_s8 + $0x10] sm:$0xff]  }
 0x48e   : > { %v1500_v29 = vpop.eup %1499  ;;  %1388 = vmatpush3.bf16.msra.mxu0 %v848_v28  ;;  %1389 = vmatprep.mubr.msk.bf16.mxu0 %vm1580_vm1, %v1579_v8 }
 0x48f   : > { %v687_v30 = vsel %vm463_vm2, %v1500_v29, 0.0  ;;  %v695_v31 = vpack.c.bf16 %v1500_v29, %v1500_v29  ;;  %1401 = vmatprep.subr.bf16.mxu0 %v1579_v8 }
 0x490   : > { %688 = vadd.xlane.f32.xlu1 %v687_v30 }
 0x491   : > { %1384 = vmatmul.mubr.msk.bf16.vlgmr.msra.gmra.mrb[8].mxu1 %vm463_vm2, %v695_v31 }
 0x492   : > { %v1502_v32 = vpop.eup %1501  ;;  %1397 = vmatprep.mubr.msk.bf16.mxu1 %vm1580_vm1, %v1579_v8  ;;  %1394 = vmatpush3.bf16.msra.mxu1 %v1481_v42 }
 0x493   : > { %v690_v33 = vsel %vm463_vm2, %v1502_v32, 0.0  ;;  %v696_v34 = vpack.c.bf16 %v1502_v32, %v1502_v32  ;;  %1395 = vmatprep.subr.bf16.mxu1 %v1579_v8  ;;  %v1285_v32 = vld [vmem:[%s1916_s5] ss:$0 sm:$0xff] }
 0x494   : > { %691 = vadd.xlane.f32.xlu0 %v690_v33 }
 0x495   : > { %1390 = vmatmul.mubr.msk.bf16.vlgmr.msra.gmra.mrb[20].mxu0 %vm463_vm2, %v696_v34 }
 0x496   : > { %1405 = vmatprep.mubr.msk.bf16.mxu0 %vm1580_vm1, %v1579_v8  ;;  %1396 = vmatpush3.bf16.msra.mxu1 %v1482_v44 }
 0x497   : > { %1409 = vmatprep.subr.bf16.mxu1 %v1579_v8  ;;  %1402 = vmatpush3.bf16.msra.mxu0 %v1483_v24 }
 0x498   : > { %682 = vadd.xlane.f32.xlu0 %v681_v35  ;;  %1403 = vmatprep.subr.bf16.mxu0 %v1579_v8 }
 0x4f3   : > { %v740_v36 = vpop.f32.mrb[4].mxu1 }
 0x4f4   : > { %v1373_v37 = vpop.f32.mrb[5].mxu1 }
 0x4f5   : > { %v743_v38 = vpop.f32.mrb[6].mxu1  ;;  %v1489_v37 = vld [vmem:[%s1919_s8 + $0x20] sm:$0xff]  }
 0x4f6   : > { %v1374_v39 = vpop.f32.mrb[7].mxu1  ;;  %v1490_v38 = vld [vmem:[%s1919_s8 + $0x28] sm:$0xff]  }
 0x4f7   : > { %v1491_v39 = vld [vmem:[%s1919_s8 + $0x30] sm:$0xff]  }
 0x519   : > { %v686_v40 = vpop.xlane.xlu0 %685 }
 0x51a   : > { %1503 = vrcp.f32 %v686_v40  ;;  %v1492_v40 = vld [vmem:[%s1919_s8 + $0x38] sm:$0xff]  }
 0x51d   : > { %v689_v41 = vpop.xlane.xlu1 %688 }
 0x51e   : > { %1505 = vrcp.f32 %v689_v41  ;;  %v1286_v41 = vld [vmem:[%s1918_s7] ss:$0 sm:$0xff] }
 0x521   : > { %v692_v43 = vpop.xlane.xlu0 %691 }
 0x522   : > { %1507 = vrcp.f32 %v692_v43 }
 0x524   : > { %v1504_v45 = vpop.eup %1503 }
 0x525   : > { %v683_v63 = vpop.xlane.xlu0 %682 }
 0x526   : > { %1509 = vrcp.f32 %v683_v63 }
 0x528   : > { %v1506_v51 = vpop.eup %1505 }
 0x52c   : > { %v1508_v57 = vpop.eup %1507 }
 0x530   : > { %v1510_v1 = vpop.eup %1509 }
 0x531   : > { %v894_v3 = vmul.f32 %v1510_v1, %v740_v36  ;;  %v1488_v36 = vld [vmem:[%s1919_s8 + $0x18] sm:$0xff]  }
 0x560   : > { %v788_v46 = vpop.f32.mrb[16].mxu0 }
 0x561   : > { %v895_v47 = vmul.f32 %v1504_v45, %v788_v46  ;;  %v1379_v48 = vpop.f32.mrb[17].mxu0 }
 0x562   : > { %v791_v49 = vpop.f32.mrb[18].mxu0 }
 0x563   : > { %899 = vrot.lane.b32.xlu1 %v895_v47, %s1587_s20  ;;  %v1380_v50 = vpop.f32.mrb[19].mxu0  ;;  %s1300_s20 = sshll.u32 %s1667_s17, 7  ;;  %s1191_s17 = scalar_lea.sflag [#allocation3], %s348_s30 }
 0x564   : > { %v836_v52 = vpop.f32.mrb[8].mxu1  ;;  %s1868_s28 = scalar_lea.hbm %s1921_s10, %s1300_s20 }
 0x565   : > { %v896_v53 = vmul.f32 %v1506_v51, %v836_v52  ;;  %v1385_v54 = vpop.f32.mrb[9].mxu1  ;;  %v1290_v52 = vld [vmem:[%s1920_s9] ss:$0 sm:$0xff] }
 0x566   : > { %v839_v55 = vpop.f32.mrb[10].mxu1 }
 0x567   : > { %v1386_v56 = vpop.f32.mrb[11].mxu1  ;;  %903 = vrot.lane.b32.xlu0 %v896_v53, %s1588_s21  ;;  %s350_s21 = scalar_lea.vmem [#allocation2], %s1267_s11  ;;  %s1590_s11 = smov [#allocation2]  }
 0x568   : > { %v884_v58 = vpop.f32.mrb[20].mxu0  ;;  %s1519_s12 = sshll.u32 %s1590_s11, 4  ;;  %s1520_s12 = int_to_ptr.vmem [resolvable:$false] %s1519_s12 }
 0x569   : > { %v897_v59 = vmul.f32 %v1508_v57, %v884_v58  ;;  %v1391_v60 = vpop.f32.mrb[21].mxu0  ;;  %s1521_s18 = scalar_lea.vmem %s1520_s12, 256 }
 0x56a   : > { %v887_v61 = vpop.f32.mrb[22].mxu0 }
 0x56b   : > { %907 = vrot.lane.b32.xlu1 %v897_v59, %s1589_s25  ;;  %v1392_v62 = vpop.f32.mrb[23].mxu0  ;;  %s1204_s25 = sshll.u32 %s350_s21, 4  ;;  %s1870_s25 = int_to_ptr.vmem [resolvable:$true] %s1204_s25 }
 0x56c   : > { %s1515_s29 = scalar_lea.vmem %s1870_s25, 128  ;;  %p1522_p0 = scmp.lt.s32.totalorder %s1870_s25, %s1520_s12 }
 0x56d   : > { %p1516_p11 = scmp.ne.s32.totalorder %s1870_s25, %s1515_s29  ;;  %p1523_p1 = scmp.lt.s32.totalorder %s1521_s18, %s1515_s29 }
 0x56f   : > { %p1517_p12 = pnand %p1516_p11, %p1684_p5  ;;  %p1524_p2 = por %p1523_p1, %p1522_p0 }
 0x571   : > { %p1518_p13 = pneg %p1517_p12 }
 0x573   : > { %p1525_p3 = pnand %p1524_p2, %p1518_p13 }
 0x5d5   : > { %v900_v2 = vpop.permute.xlu1 %899 }
 0x5d6   : > { %v910_v5 = vsel %vm463_vm2, %v894_v3, %v900_v2 }
 0x5d9   : > { %v904_v4 = vpop.permute.xlu0 %903 }
 0x5da   : > { %v912_v6 = vsel %vm911_vm5, %v910_v5, %v904_v4 }
 0x5dd   : > { %v908_v7 = vpop.permute.xlu1 %907 }
 0x5de   : > { %v914_v9 = vsel %vm913_vm6, %v912_v6, %v908_v7 }
 0x5df   : > { %v915_v10 = vpack.c.bf16 %v914_v9, %v914_v9 }
 0x5e1   : > { %1398 = vmatmul.mubr.msk.bf16.vlgmr.msra.gmra.mrb[12].mxu1 %vm358_vm0, %v915_v10 }
 0x5e2   : > { %1425 = vmatprep.mubr.msk.bf16.mxu1 %vm1580_vm1, %v1579_v8  ;;  %1410 = vmatpush3.bf16.msra.mxu1 %v1485_v25 }
 0x5e3   : > { %1411 = vmatprep.subr.bf16.mxu1 %v1579_v8 }
 0x5e6   : > { %1412 = vmatpush3.bf16.msra.mxu1 %v1486_v26 }
 0x5e7   : > { %1413 = vmatprep.subr.bf16.mxu1 %v1579_v8 }
 0x5ea   : > { %1414 = vmatpush3.bf16.msra.mxu1 %v1487_v27 }
 0x5eb   : > { %1415 = vmatprep.subr.bf16.mxu1 %v1579_v8 }
 0x5ee   : > { %1416 = vmatpush3.bf16.msra.mxu1 %v1488_v36 }
 0x5ef   : > { %1417 = vmatprep.subr.bf16.mxu1 %v1579_v8 }
 0x5f2   : > { %1418 = vmatpush3.bf16.msra.mxu1 %v1489_v37 }
 0x5f3   : > { %1419 = vmatprep.subr.bf16.mxu1 %v1579_v8 }
 0x5f6   : > { %1420 = vmatpush3.bf16.msra.mxu1 %v1490_v38 }
 0x5f7   : > { %1421 = vmatprep.subr.bf16.mxu1 %v1579_v8 }
 0x5fa   : > { %1422 = vmatpush3.bf16.msra.mxu1 %v1491_v39 }
 0x5fb   : > { %1423 = vmatprep.subr.bf16.mxu1 %v1579_v8 }
 0x5fe   : > { %1424 = vmatpush3.bf16.msra.mxu1 %v1492_v40 }
 0x6b4   : > { %v976_v12 = vpop.f32.mrb[12].mxu1 }
 0x6b5   : > { %v977_v13 = vadd.f32 %v1281_v11, %v976_v12  ;;  %v1399_v14 = vpop.f32.mrb[13].mxu1 }
 0x6b6   : > { %v979_v15 = vpop.f32.mrb[14].mxu1 }
 0x6b7   : > { %v1808_v16 = vadd.f32 %v977_v13, %v1699_v0  ;;  %v1400_v17 = vpop.f32.mrb[15].mxu1  ;;  %v1484_v0 = vld [vmem:[%s1917_s6 + $0x8] sm:$0xff]  }
 0x6b8   : > { %1404 = vmatpush3.bf16.msra.mxu0 %v1484_v0 }
 0x6b9   : > { %v984_v18 = vsel %vm358_vm0, %v1808_v16, 0.0 }
 0x6ba   : > { %985 = vadd.xlane.f32.xlu1 %v984_v18 }
 0x747   : > { %v986_v19 = vpop.xlane.xlu1 %985 }
 0x748   : > { %v987_v20 = vmul.f32 0.03125, %v986_v19 }
 0x74a   : > { %v988_v21 = vsub.f32 %v1808_v16, %v987_v20 }
 0x74c   : > { %v989_v22 = vmul.f32 %v988_v21, %v988_v21 }
 0x74e   : > { %v990_v23 = vsel %vm358_vm0, %v989_v22, 0.0 }
 0x74f   : > { %991 = vadd.xlane.f32.xlu0 %v990_v23 }
 0x7dc   : > { %v992_v28 = vpop.xlane.xlu0 %991 }
 0x7dd   : > { %v993_v29 = vmul.f32 0.03125, %v992_v28 }
 0x7df   : > { %v994_v30 = vadd.f32 1e-05, %v993_v29 }
 0x7e1   : > { %1511 = vrsqrt.f32 %v994_v30 }
 0x7eb   : > { %v1512_v31 = vpop.eup %1511 }
 0x7ec   : > { %v996_v33 = vmul.f32 %v1512_v31, %v988_v21 }
 0x7ee   : > { %v1003_v34 = vmul.f32 %v1285_v32, %v996_v33 }
 0x7f0   : > { %v1004_v35 = vpack.c.bf16 %v1003_v34, %v1003_v34 }
 0x7f2   : > { %1406 = vmatmul.mubr.msk.bf16.vlgmr.msra.gmra.mrb[24].mxu0 %vm358_vm0, %v1004_v35 }
 0x8c5   : > { %v1065_v42 = vpop.f32.mrb[24].mxu0 }
 0x8c6   : > { %v1066_v43 = vadd.f32 %v1286_v41, %v1065_v42  ;;  %v1407_v44 = vpop.f32.mrb[25].mxu0 }
 0x8c7   : > { %v1068_v45 = vpop.f32.mrb[26].mxu0 }
 0x8c8   : > { %v1072_v46 = vmul.f32 0.70710677, %v1066_v43  ;;  %v1408_v47 = vpop.f32.mrb[27].mxu0  ;;  %v1071_v8 = vmul.f32 0.5, %v1066_v43 }
 0x8ca   : > { %1513 = verf.f32 %v1072_v46 }
 0x8d4   : > { %v1514_v48 = vpop.eup %1513 }
 0x8d5   : > { %v1074_v49 = vadd.f32 1.0, %v1514_v48 }
 0x8d7   : > { %v1075_v50 = vmul.f32 %v1074_v49, %v1071_v8 }
 0x8d9   : > { %v1076_v51 = vpack.c.bf16 %v1075_v50, %v1075_v50 }
 0x8db   : > { %1426 = vmatmul.mubr.bf16.vlgmr.msra.gmra.mrb[16].mxu1 %v1076_v51 }
 0x9ae   : > { %v1182_v53 = vpop.f32.mrb[16].mxu1 }
 0x9af   : > { %v1183_v54 = vadd.f32 %v1290_v52, %v1182_v53  ;;  %v1427_v55 = vpop.f32.mrb[17].mxu1 }
 0x9b0   : > { %v1185_v56 = vpop.f32.mrb[18].mxu1 }
 0x9b1   : > { %v1188_v57 = vadd.f32 %v1183_v54, %v1808_v16  ;;  %v1428_v58 = vpop.f32.mrb[19].mxu1 }
 0x9b3   : > { %1189 = vst.msk [vmem:[%s350_s21] sm:$0xff] %vm358_vm0, %v1188_v57 }
 0x9b4   : > { %1528 = shalt.err (!%p1525_p3)
}
 0x9b5   : > { %s1529_s30 = scalar_lea.hbm %s1868_s28, 128  ;;  %s1533_s26 = scalar_lea.hbm %s1921_s10, 256 }
 0x9b6   : > { %p1530_p4 = scmp.ne.s32.totalorder %s1868_s28, %s1529_s30  ;;  %p1534_p9 = scmp.lt.u32.totalorder %s1868_s28, %s1921_s10 }
 0x9b7   : > { %p1535_p10 = scmp.lt.u32.totalorder %s1533_s26, %s1529_s30  ;;  %p1537_p12 = scmp.lt.u32.totalorder %s1529_s30, %s1868_s28 }
 0x9b8   : > { %p1531_p7 = pnand %p1530_p4, %p1684_p5 }
 0x9b9   : > { %p1536_p11 = por %p1535_p10, %p1534_p9 }
 0x9ba   : > { %p1532_p8 = pneg %p1531_p7 }
 0x9bb   : > { %p1538_p13 = por %p1537_p12, %p1536_p11 }
 0x9bd   : > { %p1539_p0 = pnand %p1538_p13, %p1532_p8 }
 0x9bf   : > { %1542 = shalt.err (!%p1539_p0)
}
 0x9c0   : > { %1429 = dma.vmem_to_hbm [thread:$0]  (%p1684_p5), %s1870_s25, 128, %s1868_s28, %s1191_s17  }
 0x9c1 PF: > { %p1435_p1 = scmp.ge.s32.totalorder %s1577_s16, 2  ;;  %s1216_s29 = sand.u32 1, %s1565_s13  }
 0x9c2   : > { %s1217_s12 = scalar_lea.sflag [#allocation3], %s1216_s29 }
 0x9c3   : > { %p1432_p2 = pnand %p1435_p1, %p1688_p6 }
 0x9c5   : > { %1560 = dma.done.wait (!%p1432_p2), %s1217_s12, 128  }
 0x9c6   : > { %1562 = vsyncadd (!%p1432_p2), %s1217_s12, 4294967168  ;;  %p20_p3 = scmp.ge.s32.totalorder %s1671_s19, 4   ;;  %s1924_s13 = smov %s1569_s14 }
 0x9c7   : > { %s1925_s14 = smov %s1573_s15  ;;  %s1926_s15 = smov %s1682_s22 }
 0x9c8   : > { %s1927_s16 = smov %s1671_s19  ;;  %22 = sbr.rel (!%p20_p3) target bundleno = 3 (0x3), region = 95 }
 0x9cf   :  { %1222 = vsyncpa [#allocation3], 1 }
 0x9d0   :  { %1224 = vsyncpa [#allocation3 + $0x1], 1 }

</bundles_post_ra>
